<compile_context>
chip_gen: v7x
topology: tpu7x:2x2x1
jax: 0.10.0
libtpu: 0.0.40
codegen_flags: <defaults>
</compile_context>

<pallas_src>
import jax
import jax.numpy as jnp
from jax.experimental import pallas as pl
from jax.experimental.pallas import tpu as pltpu

# ---- module constants / demo sizes ----
HID = 3      # hiddenDim (module-level constant in the PyTorch file)
ATT = 5      # attentionDim
B = 2        # batch
S = 8        # sentences per batch element (sublane axis)
L = 128      # words per sentence = softmax axis (lane axis)
LANES = 128  # lane-padded output width


def att_layer1_kernel(p_ref, x_ref, o_ref):
    """TB batch elements per grid step.

    p_ref : SMEM (HID*ATT + 2*ATT,) f32  = [W row-major | b | u]
    x_ref : VMEM (TB, HID, S, L)         hidden channels as planes, L on lanes
    o_ref : VMEM (TB, S, 128)            lane-padded output slab (first HID lanes valid)
    """
    tb, hid, s, l = x_ref.shape
    lanes = o_ref.shape[2]

    x = x_ref[...]                                   # (TB, HID, S, L)
    xs = [x[:, h] for h in range(hid)]               # HID x (TB, S, L)

    # score[t, s, l] = sum_a u[a] * tanh(b[a] + sum_h W[h, a] * x_h[t, s, l])
    # Static unrolled loops over HID/ATT -> pure VPU + EUP work, no MXU on the path.
    score = None
    for a in range(ATT):
        pre = xs[0] * p_ref[0 * ATT + a]
        for h in range(1, hid):
            pre = pre + xs[h] * p_ref[h * ATT + a]
        pre = pre + p_ref[hid * ATT + a]                       # + b[a]
        term = jnp.tanh(pre) * p_ref[hid * ATT + ATT + a]      # * u[a]
        score = term if score is None else score + term

    # Matches torch.exp with NO max-subtraction (faithful to the module, including
    # its overflow behavior for extreme pre-activations).
    e = jnp.exp(score)                               # (TB, S, L)
    w = e / jnp.sum(e, axis=-1, keepdims=True)       # exact divide (attention weights)

    # Lane-dense output: place the HID weighted-sum columns in the first HID lanes of
    # a full 128-lane slab via VPU selects (no lane concatenation / masked stores).
    lane = jax.lax.broadcasted_iota(jnp.int32, (tb, s, lanes), 2)
    out = jnp.zeros((tb, s, lanes), jnp.float32)
    for h in range(hid):
        col = jnp.sum(xs[h] * w, axis=-1, keepdims=True)       # (TB, S, 1)
        out = jnp.where(lane == h, col, out)
    o_ref[...] = out


def pack_params(W, b, u):
    """Pack layer-constant parameters once (hoisted out of the per-forward path)."""
    return jnp.concatenate([
        jnp.asarray(W, jnp.float32).reshape(-1),
        jnp.asarray(b, jnp.float32).reshape(-1),
        jnp.asarray(u, jnp.float32).reshape(-1),
    ])


def _choose_tb(Bq, per_elem_bytes, budget_bytes=4 << 20):
    """Batch elements per grid step.

    (a) double-buffered input block stays under a conservative 4 MiB budget
        (safe vs. v5e's 16 MiB scoped-VMEM default and v7x's 64 MiB physical VMEM),
    (b) keeps >=2 parallel grid steps when B >= 2 (v7x has 2 TensorCores),
    (c) divides B exactly (no partial blocks)."""
    cap = max(1, budget_bytes // (2 * per_elem_bytes))
    if Bq >= 2:
        cap = min(cap, Bq // 2)
    tb = 1
    for d in range(1, max(1, min(Bq, cap)) + 1):
        if Bq % d == 0:
            tb = d
    return tb


@jax.jit
def att_layer1(params, x):
    """params: packed (HID*ATT + 2*ATT,) f32; x: (B, S, L, HID). Returns (B, S, HID)."""
    Bq, Sq, Lq, Hq = x.shape
    tb = _choose_tb(Bq, Hq * Sq * Lq * 4)
    n_steps = Bq // tb

    # Layout plumbing (fused under jit): (B, S, L, H) -> (B, H, S, L), softmax axis L on lanes.
    xt = jnp.transpose(x, (0, 3, 1, 2)).astype(jnp.float32)

    padded = pl.pallas_call(
        att_layer1_kernel,
        out_shape=jax.ShapeDtypeStruct((Bq, Sq, LANES), jnp.float32),
        grid_spec=pltpu.PrefetchScalarGridSpec(
            num_scalar_prefetch=0,
            grid=(n_steps,),
            in_specs=[
                pl.BlockSpec(memory_space=pltpu.MemorySpace.SMEM),        # packed params
                pl.BlockSpec((tb, Hq, Sq, Lq), lambda i: (i, 0, 0, 0)),   # TB batch elems / step
            ],
            out_specs=pl.BlockSpec((tb, Sq, LANES), lambda i: (i, 0, 0)),  # lane-dense slab
        ),
        compiler_params=pltpu.CompilerParams(
            dimension_semantics=("parallel",)),   # independent batch tiles -> megacore/v7x sharding
    )(params, xt)

    return padded[..., :Hq]        # cheap slice, fused under jit


# ---------------- pure-JAX reference (mirrors the PyTorch forward) ----------------
def reference(x, W, b, u):
    uit = jnp.tanh(jnp.matmul(x, W) + b)            # (B, S, L, ATT)
    ait = jnp.squeeze(jnp.matmul(uit, u), -1)       # (B, S, L)
    ait = jnp.exp(ait)
    ait = ait / jnp.sum(ait, axis=2, keepdims=True)
    return jnp.sum(x * ait[..., None], axis=2)      # (B, S, HID)


if __name__ == "__main__":
    key = jax.random.PRNGKey(0)
    k0, k1, k2, k3 = jax.random.split(key, 4)
    f32 = jnp.float32

    x = jax.random.normal(k0, (B, S, L, HID), f32)
    W = jax.random.normal(k1, (HID, ATT), f32)      # torch.randn(hiddenDim, attentionDim)
    b = jax.random.normal(k2, (ATT,), f32)          # torch.randn(attentionDim)
    u = jax.random.normal(k3, (ATT, 1), f32)        # torch.randn(attentionDim, 1)

    params = pack_params(W, b, u)                   # packed once (layer constants)

    out = jax.block_until_ready(att_layer1(params, x))
    ref = reference(x, W, b, u)

    assert out.shape == (B, S, HID), out.shape
    assert jnp.allclose(out, ref, atol=1e-4, rtol=1e-4), float(jnp.max(jnp.abs(out - ref)))

    # TODO(synk): the PyTorch module also caches the attention weights as `self.ait`
    # (a side effect on the module object); only the functional forward output is returned here.
    print("KERNEL_OK")
</pallas_src>

<mosaic_0001>
module attributes {stable_mosaic.version = 11 : i64} {
  func.func @att_layer1_kernel(%arg0: i32, %arg1: memref<25xf32, #tpu.memory_space<smem>>, %arg2: memref<1x3x8x128xf32, #tpu.memory_space<vmem>>, %arg3: memref<1x8x128xf32, #tpu.memory_space<vmem>>) attributes {dimension_semantics = [#tpu.dimension_semantics<parallel>], iteration_bounds = array<i64: 2>, scalar_prefetch = 0 : i64, scratch_operands = 0 : i64, tpu.core_type = #tpu.core_type<tc>, window_params = [{transform_indices = @transform_0, window_bounds = array<i64: 25>}, {transform_indices = @transform_1, window_bounds = array<i64: 1, 3, 8, 128>}, {transform_indices = @transform_2, window_bounds = array<i64: 1, 8, 128>}]} {
    %c0 = arith.constant 0 : index
    %c0_0 = arith.constant 0 : index
    %c0_1 = arith.constant 0 : index
    %c0_2 = arith.constant 0 : index
    %0 = vector.load %arg2[%c0, %c0_0, %c0_1, %c0_2] : memref<1x3x8x128xf32, #tpu.memory_space<vmem>>, vector<1x3x8x128xf32>
    %1 = vector.extract_strided_slice %0 {offsets = [0, 0, 0, 0], sizes = [1, 1, 8, 128], strides = [1, 1, 1, 1]} : vector<1x3x8x128xf32> to vector<1x1x8x128xf32>
    %2 = vector.shape_cast %1 : vector<1x1x8x128xf32> to vector<1x8x128xf32>
    %3 = vector.extract_strided_slice %0 {offsets = [0, 1, 0, 0], sizes = [1, 1, 8, 128], strides = [1, 1, 1, 1]} : vector<1x3x8x128xf32> to vector<1x1x8x128xf32>
    %4 = vector.shape_cast %3 : vector<1x1x8x128xf32> to vector<1x8x128xf32>
    %5 = vector.extract_strided_slice %0 {offsets = [0, 2, 0, 0], sizes = [1, 1, 8, 128], strides = [1, 1, 1, 1]} : vector<1x3x8x128xf32> to vector<1x1x8x128xf32>
    %6 = vector.shape_cast %5 : vector<1x1x8x128xf32> to vector<1x8x128xf32>
    %c0_3 = arith.constant 0 : index
    %7 = memref.load %arg1[%c0_3] : memref<25xf32, #tpu.memory_space<smem>>
    %8 = vector.broadcast %7 : f32 to vector<1x8x128xf32>
    %9 = arith.mulf %2, %8 : vector<1x8x128xf32>
    %c5 = arith.constant 5 : index
    %10 = memref.load %arg1[%c5] : memref<25xf32, #tpu.memory_space<smem>>
    %11 = vector.broadcast %10 : f32 to vector<1x8x128xf32>
    %12 = arith.mulf %4, %11 : vector<1x8x128xf32>
    %13 = arith.addf %9, %12 : vector<1x8x128xf32>
    %c10 = arith.constant 10 : index
    %14 = memref.load %arg1[%c10] : memref<25xf32, #tpu.memory_space<smem>>
    %15 = vector.broadcast %14 : f32 to vector<1x8x128xf32>
    %16 = arith.mulf %6, %15 : vector<1x8x128xf32>
    %17 = arith.addf %13, %16 : vector<1x8x128xf32>
    %c15 = arith.constant 15 : index
    %18 = memref.load %arg1[%c15] : memref<25xf32, #tpu.memory_space<smem>>
    %19 = vector.broadcast %18 : f32 to vector<1x8x128xf32>
    %20 = arith.addf %17, %19 : vector<1x8x128xf32>
    %21 = math.tanh %20 : vector<1x8x128xf32>
    %c20 = arith.constant 20 : index
    %22 = memref.load %arg1[%c20] : memref<25xf32, #tpu.memory_space<smem>>
    %23 = vector.broadcast %22 : f32 to vector<1x8x128xf32>
    %24 = arith.mulf %21, %23 : vector<1x8x128xf32>
    %c1 = arith.constant 1 : index
    %25 = memref.load %arg1[%c1] : memref<25xf32, #tpu.memory_space<smem>>
    %26 = vector.broadcast %25 : f32 to vector<1x8x128xf32>
    %27 = arith.mulf %2, %26 : vector<1x8x128xf32>
    %c6 = arith.constant 6 : index
    %28 = memref.load %arg1[%c6] : memref<25xf32, #tpu.memory_space<smem>>
    %29 = vector.broadcast %28 : f32 to vector<1x8x128xf32>
    %30 = arith.mulf %4, %29 : vector<1x8x128xf32>
    %31 = arith.addf %27, %30 : vector<1x8x128xf32>
    %c11 = arith.constant 11 : index
    %32 = memref.load %arg1[%c11] : memref<25xf32, #tpu.memory_space<smem>>
    %33 = vector.broadcast %32 : f32 to vector<1x8x128xf32>
    %34 = arith.mulf %6, %33 : vector<1x8x128xf32>
    %35 = arith.addf %31, %34 : vector<1x8x128xf32>
    %c16 = arith.constant 16 : index
    %36 = memref.load %arg1[%c16] : memref<25xf32, #tpu.memory_space<smem>>
    %37 = vector.broadcast %36 : f32 to vector<1x8x128xf32>
    %38 = arith.addf %35, %37 : vector<1x8x128xf32>
    %39 = math.tanh %38 : vector<1x8x128xf32>
    %c21 = arith.constant 21 : index
    %40 = memref.load %arg1[%c21] : memref<25xf32, #tpu.memory_space<smem>>
    %41 = vector.broadcast %40 : f32 to vector<1x8x128xf32>
    %42 = arith.mulf %39, %41 : vector<1x8x128xf32>
    %43 = arith.addf %24, %42 : vector<1x8x128xf32>
    %c2 = arith.constant 2 : index
    %44 = memref.load %arg1[%c2] : memref<25xf32, #tpu.memory_space<smem>>
    %45 = vector.broadcast %44 : f32 to vector<1x8x128xf32>
    %46 = arith.mulf %2, %45 : vector<1x8x128xf32>
    %c7 = arith.constant 7 : index
    %47 = memref.load %arg1[%c7] : memref<25xf32, #tpu.memory_space<smem>>
    %48 = vector.broadcast %47 : f32 to vector<1x8x128xf32>
    %49 = arith.mulf %4, %48 : vector<1x8x128xf32>
    %50 = arith.addf %46, %49 : vector<1x8x128xf32>
    %c12 = arith.constant 12 : index
    %51 = memref.load %arg1[%c12] : memref<25xf32, #tpu.memory_space<smem>>
    %52 = vector.broadcast %51 : f32 to vector<1x8x128xf32>
    %53 = arith.mulf %6, %52 : vector<1x8x128xf32>
    %54 = arith.addf %50, %53 : vector<1x8x128xf32>
    %c17 = arith.constant 17 : index
    %55 = memref.load %arg1[%c17] : memref<25xf32, #tpu.memory_space<smem>>
    %56 = vector.broadcast %55 : f32 to vector<1x8x128xf32>
    %57 = arith.addf %54, %56 : vector<1x8x128xf32>
    %58 = math.tanh %57 : vector<1x8x128xf32>
    %c22 = arith.constant 22 : index
    %59 = memref.load %arg1[%c22] : memref<25xf32, #tpu.memory_space<smem>>
    %60 = vector.broadcast %59 : f32 to vector<1x8x128xf32>
    %61 = arith.mulf %58, %60 : vector<1x8x128xf32>
    %62 = arith.addf %43, %61 : vector<1x8x128xf32>
    %c3 = arith.constant 3 : index
    %63 = memref.load %arg1[%c3] : memref<25xf32, #tpu.memory_space<smem>>
    %64 = vector.broadcast %63 : f32 to vector<1x8x128xf32>
    %65 = arith.mulf %2, %64 : vector<1x8x128xf32>
    %c8 = arith.constant 8 : index
    %66 = memref.load %arg1[%c8] : memref<25xf32, #tpu.memory_space<smem>>
    %67 = vector.broadcast %66 : f32 to vector<1x8x128xf32>
    %68 = arith.mulf %4, %67 : vector<1x8x128xf32>
    %69 = arith.addf %65, %68 : vector<1x8x128xf32>
    %c13 = arith.constant 13 : index
    %70 = memref.load %arg1[%c13] : memref<25xf32, #tpu.memory_space<smem>>
    %71 = vector.broadcast %70 : f32 to vector<1x8x128xf32>
    %72 = arith.mulf %6, %71 : vector<1x8x128xf32>
    %73 = arith.addf %69, %72 : vector<1x8x128xf32>
    %c18 = arith.constant 18 : index
    %74 = memref.load %arg1[%c18] : memref<25xf32, #tpu.memory_space<smem>>
    %75 = vector.broadcast %74 : f32 to vector<1x8x128xf32>
    %76 = arith.addf %73, %75 : vector<1x8x128xf32>
    %77 = math.tanh %76 : vector<1x8x128xf32>
    %c23 = arith.constant 23 : index
    %78 = memref.load %arg1[%c23] : memref<25xf32, #tpu.memory_space<smem>>
    %79 = vector.broadcast %78 : f32 to vector<1x8x128xf32>
    %80 = arith.mulf %77, %79 : vector<1x8x128xf32>
    %81 = arith.addf %62, %80 : vector<1x8x128xf32>
    %c4 = arith.constant 4 : index
    %82 = memref.load %arg1[%c4] : memref<25xf32, #tpu.memory_space<smem>>
    %83 = vector.broadcast %82 : f32 to vector<1x8x128xf32>
    %84 = arith.mulf %2, %83 : vector<1x8x128xf32>
    %c9 = arith.constant 9 : index
    %85 = memref.load %arg1[%c9] : memref<25xf32, #tpu.memory_space<smem>>
    %86 = vector.broadcast %85 : f32 to vector<1x8x128xf32>
    %87 = arith.mulf %4, %86 : vector<1x8x128xf32>
    %88 = arith.addf %84, %87 : vector<1x8x128xf32>
    %c14 = arith.constant 14 : index
    %89 = memref.load %arg1[%c14] : memref<25xf32, #tpu.memory_space<smem>>
    %90 = vector.broadcast %89 : f32 to vector<1x8x128xf32>
    %91 = arith.mulf %6, %90 : vector<1x8x128xf32>
    %92 = arith.addf %88, %91 : vector<1x8x128xf32>
    %c19 = arith.constant 19 : index
    %93 = memref.load %arg1[%c19] : memref<25xf32, #tpu.memory_space<smem>>
    %94 = vector.broadcast %93 : f32 to vector<1x8x128xf32>
    %95 = arith.addf %92, %94 : vector<1x8x128xf32>
    %96 = math.tanh %95 : vector<1x8x128xf32>
    %c24 = arith.constant 24 : index
    %97 = memref.load %arg1[%c24] : memref<25xf32, #tpu.memory_space<smem>>
    %98 = vector.broadcast %97 : f32 to vector<1x8x128xf32>
    %99 = arith.mulf %96, %98 : vector<1x8x128xf32>
    %100 = arith.addf %81, %99 : vector<1x8x128xf32>
    %101 = math.exp %100 : vector<1x8x128xf32>
    %cst = arith.constant dense<0.000000e+00> : vector<1x8xf32>
    %102 = vector.multi_reduction <add>, %101, %cst [2] : vector<1x8x128xf32> to vector<1x8xf32>
    %103 = vector.shape_cast %102 : vector<1x8xf32> to vector<1x8x1xf32>
    %104 = vector.broadcast %103 : vector<1x8x1xf32> to vector<1x8x128xf32>
    %105 = arith.divf %101, %104 : vector<1x8x128xf32>
    %106 = tpu.iota {dimensions = array<i32: 2>} : vector<1x8x128xi32>
    %cst_4 = arith.constant 0.000000e+00 : f32
    %107 = vector.broadcast %cst_4 : f32 to vector<1x8x128xf32>
    %108 = arith.mulf %2, %105 : vector<1x8x128xf32>
    %cst_5 = arith.constant dense<0.000000e+00> : vector<1x8xf32>
    %109 = vector.multi_reduction <add>, %108, %cst_5 [2] : vector<1x8x128xf32> to vector<1x8xf32>
    %110 = vector.shape_cast %109 : vector<1x8xf32> to vector<1x8x1xf32>
    %c0_i32 = arith.constant 0 : i32
    %111 = vector.broadcast %c0_i32 : i32 to vector<1x8x128xi32>
    %112 = arith.cmpi eq, %106, %111 : vector<1x8x128xi32>
    %113 = vector.shape_cast %110 : vector<1x8x1xf32> to vector<1x8x1xf32>
    %114 = vector.broadcast %113 : vector<1x8x1xf32> to vector<1x8x128xf32>
    %115 = arith.select %112, %114, %107 : vector<1x8x128xi1>, vector<1x8x128xf32>
    %116 = arith.mulf %4, %105 : vector<1x8x128xf32>
    %cst_6 = arith.constant dense<0.000000e+00> : vector<1x8xf32>
    %117 = vector.multi_reduction <add>, %116, %cst_6 [2] : vector<1x8x128xf32> to vector<1x8xf32>
    %118 = vector.shape_cast %117 : vector<1x8xf32> to vector<1x8x1xf32>
    %c1_i32 = arith.constant 1 : i32
    %119 = vector.broadcast %c1_i32 : i32 to vector<1x8x128xi32>
    %120 = arith.cmpi eq, %106, %119 : vector<1x8x128xi32>
    %121 = vector.shape_cast %118 : vector<1x8x1xf32> to vector<1x8x1xf32>
    %122 = vector.broadcast %121 : vector<1x8x1xf32> to vector<1x8x128xf32>
    %123 = arith.select %120, %122, %115 : vector<1x8x128xi1>, vector<1x8x128xf32>
    %124 = arith.mulf %6, %105 : vector<1x8x128xf32>
    %cst_7 = arith.constant dense<0.000000e+00> : vector<1x8xf32>
    %125 = vector.multi_reduction <add>, %124, %cst_7 [2] : vector<1x8x128xf32> to vector<1x8xf32>
    %126 = vector.shape_cast %125 : vector<1x8xf32> to vector<1x8x1xf32>
    %c2_i32 = arith.constant 2 : i32
    %127 = vector.broadcast %c2_i32 : i32 to vector<1x8x128xi32>
    %128 = arith.cmpi eq, %106, %127 : vector<1x8x128xi32>
    %129 = vector.shape_cast %126 : vector<1x8x1xf32> to vector<1x8x1xf32>
    %130 = vector.broadcast %129 : vector<1x8x1xf32> to vector<1x8x128xf32>
    %131 = arith.select %128, %130, %123 : vector<1x8x128xi1>, vector<1x8x128xf32>
    %c0_8 = arith.constant 0 : index
    %c0_9 = arith.constant 0 : index
    %c0_10 = arith.constant 0 : index
    %132 = vector.load %arg3[%c0_8, %c0_9, %c0_10] : memref<1x8x128xf32, #tpu.memory_space<vmem>>, vector<1x8x128xf32>
    tpu.vector_store %arg3[%c0_8, %c0_9, %c0_10], %131 {strides = array<i32>} : memref<1x8x128xf32, #tpu.memory_space<vmem>>, vector<1x8x128xf32>,
    return
  }
  func.func @transform_0(%arg0: i32) -> i32 {
    %c0_i32 = arith.constant 0 : i32
    %c0_i32_0 = arith.constant 0 : i32
    return %c0_i32 : i32
  }
  func.func @transform_1(%arg0: i32) -> (i32, i32, i32, i32) {
    %c0_i32 = arith.constant 0 : i32
    %c0_i32_0 = arith.constant 0 : i32
    %c0_i32_1 = arith.constant 0 : i32
    %c0_i32_2 = arith.constant 0 : i32
    return %arg0, %c0_i32, %c0_i32_0, %c0_i32_1 : i32, i32, i32, i32
  }
  func.func @transform_2(%arg0: i32) -> (i32, i32, i32) {
    %c0_i32 = arith.constant 0 : i32
    %c0_i32_0 = arith.constant 0 : i32
    %c0_i32_1 = arith.constant 0 : i32
    return %arg0, %c0_i32, %c0_i32_0 : i32, i32, i32
  }
}

</mosaic_0001>

<bundles_post_ra>
// kernel: att_layer1.1
= control target key start
LH: loop header
LB: loop body
LE: loop exit
PB: predicated region body
PF: predicated region fallthrough
CT: control target
= control target key end

     0   :  { %7 = vsyncpa [#allocation4], 0  ;;  %s771_s0 = inlined_call_operand.vmem [shape: f32[25], index: 0, kind: input, shape index: {}]   ;;  %s772_s1 = inlined_call_operand.hbm [shape: f32[2,3,8,128], index: 1, kind: input, shape index: {}]   ;;  %s773_s2 = inlined_call_operand.vmem [shape: f32[2,8,128], index: 2, kind: output, shape index: {}]  }
   0x1   :  { %8 = vsyncpa [#allocation3], 0 }
   0x2   :  { %10 = vsyncpa [#allocation3 + $0x1], 0  ;;  %s581_s9 = smov 0   ;;  %s583_s10 = smov 0  }
   0x3   :  { %s585_s11 = smov 0   ;;  %s587_s12 = smov 0  }
   0x4 LB: > { %s600_s13 = sadd.s32 4294967295, %s560_s12   ;;  %s603_s14 = sadd.s32 1, %s560_s12   ;;  %s560_s12 = sphi %s587_s12, %s786_s12   ;;  %s556_s11 = sphi %s585_s11, %s785_s11   ;;  %s552_s10 = sphi %s583_s10, %s784_s10   ;;  %s548_s9 = sphi %s581_s9, %s783_s9  }
   0x5   : > { %s41_s15 = ssub.s32 %s560_s12, %s603_s14  ;;  %s44_s16 = sadd.s32 1, %s556_s11 }
   0x6   : > { %p42_p0 = scmp.eq.s32.totalorder %s41_s15, 0  ;;  %p51_p1 = scmp.ne.s32.totalorder %s556_s11, %s552_s10 }
   0x7   : > { %p52_p2 = scmp.eq.s32.totalorder %s560_s12, 0  ;;  %p57_p3 = scmp.ne.s32.totalorder %s552_s10, %s548_s9 }
   0x8   : > { %s613_s17 = scalar_select %p42_p0, %s556_s11, %s44_s16  }
   0x9   : > { %p53_p4 = por %p52_p2, %p51_p1  ;;  %p775_p5 = scmp.eq.s32.totalorder %s600_s13, 0 }
   0xa   : > { %p375_p6 = scmp.ge.s32.totalorder %s560_s12, 1  ;;  %p94_p7 = scmp.lt.s32.totalorder %s560_s12, 3 }
   0xb   : > { %p620_p8 = por %p775_p5, %p57_p3  ;;  %s107_s22 = sshll.u32 %s771_s0, 4  ;;  %s108_s22 = int_to_ptr.vmem [resolvable:$true] %s107_s22 }
   0xc   : > { %p624_p9 = pnand %p375_p6, %p94_p7  ;;  %p426_p11 = scmp.lt.s32.totalorder %s560_s12, 2 }
   0xd   : > { %s776_s18 = scalar_select %p620_p8, 1, 0 }
   0xe   : > { %p417_p10 = pneg %p624_p9  ;;  %s118_s23 = sand.u32 1, %s556_s11  }
   0xf   : > { %p641_p13 = pnand %p426_p11, %p53_p4  ;;  %s408_s26 = smul.u32 24, %s118_s23 }
  0x10   : > { %p637_p12 = pnand %p417_p10, %p775_p5  ;;  %s409_s27 = smul.u32 384, %s560_s12 }
  0x11   : > { %s477_s28 = scalar_lea.vmem %s108_s22, 16  ;;  %p485_p6 = scmp.lt.s32.totalorder %s108_s22, %s108_s22 }
  0x12   : > { %p478_p0 = scmp.ne.s32.totalorder %s108_s22, %s477_s28  ;;  %p479_p1 = pneg %p637_p12 }
  0x13   : > { %p486_p7 = scmp.lt.s32.totalorder %s477_s28, %s477_s28 }
  0x14   : > { %p480_p2 = pnand %p479_p1, %p478_p0 }
  0x15   : > { %p487_p8 = por %p486_p7, %p485_p6 }
  0x16   : > { %p481_p3 = pneg %p480_p2 }
  0x18   : > { %p488_p10 = pnand %p487_p8, %p481_p3 }
  0x1a   : > { %491 = shalt.err (!%p488_p10)
}
  0x1b   : > { %s562_s29 = smov [#allocation2]   ;;  %s653_s4 = scalar_lea.hbm %s772_s1, %s409_s27 }
  0x1c   : > { %420 = dma.vmem_to_smem (!%p637_p12), %s108_s22, 16, %s562_s29, [#allocation4]  }
  0x1d   : > { %s122_s5 = scalar_lea.vmem [#allocation5], %s408_s26  ;;  %s657_s7 = scalar_lea.sflag [#allocation3], %s118_s23 }
  0x1e   : > { %s129_s6 = sshll.u32 %s122_s5, 4  ;;  %s492_s8 = scalar_lea.hbm %s653_s4, 384  ;;  %s655_s6 = int_to_ptr.vmem [resolvable:$true] %s129_s6 }
  0x1f   : > { %p493_p4 = scmp.ne.s32.totalorder %s653_s4, %s492_s8  ;;  %p494_p8 = pneg %p641_p13 }
  0x20   : > { %s497_s15 = scalar_lea.hbm %s772_s1, 768  ;;  %p498_p0 = scmp.lt.u32.totalorder %s653_s4, %s772_s1 }
  0x21   : > { %p495_p11 = pnand %p494_p8, %p493_p4  ;;  %p499_p1 = scmp.lt.u32.totalorder %s497_s15, %s492_s8 }
  0x22   : > { %p501_p3 = scmp.lt.u32.totalorder %s492_s8, %s653_s4 }
  0x23   : > { %p496_p12 = pneg %p495_p11  ;;  %p500_p2 = por %p499_p1, %p498_p0 }
  0x25   : > { %p502_p6 = por %p501_p3, %p500_p2 }
  0x27   : > { %p503_p7 = pnand %p502_p6, %p496_p12 }
  0x29   : > { %506 = shalt.err (!%p503_p7)
}
  0x2a   : > { %s507_s21 = scalar_lea.vmem %s655_s6, 384  ;;  %s563_s22 = smov [#allocation5]  }
  0x2b   : > { %p508_p10 = scmp.ne.s32.totalorder %s655_s6, %s507_s21  ;;  %s512_s23 = sshll.u32 %s563_s22, 4  ;;  %s513_s23 = int_to_ptr.vmem [resolvable:$false] %s512_s23 }
  0x2c   : > { %s514_s24 = scalar_lea.vmem %s513_s23, 768  ;;  %p515_p5 = scmp.lt.s32.totalorder %s655_s6, %s513_s23 }
  0x2d   : > { %p510_p4 = pnand %p508_p10, %p494_p8  ;;  %p516_p0 = scmp.lt.s32.totalorder %s514_s24, %s507_s21 }
  0x2f   : > { %p511_p11 = pneg %p510_p4  ;;  %p517_p1 = por %p516_p0, %p515_p5 }
  0x31   : > { %p518_p2 = pnand %p517_p1, %p511_p11 }
  0x33   : > { %521 = shalt.err (!%p518_p2)
}
  0x34   : > { %s564_s26 = smov 128   ;;  %s565_s27 = smov 8  }
  0x35   : > { %424 = dma.hbm_to_vmem [thread:$0]  (!%p641_p13), %s653_s4, 384, %s655_s6, %s657_s7, %s564_s26, %s564_s26, %s565_s27  }
  0x36   : > { %141 = sbr.rel (%p624_p9) target bundleno = 427 (0x1ab), region = 28  ;;  %p780_p8 = scmp.eq.s32.totalorder (!%p624_p9), %s600_s13, 0 }
  0x3d   : > { %539 = dma.done.wait (%p780_p8), [#allocation4], 16   ;;  %p781_p12 = pmov %p780_p8 }
  0x3e   : > { %s147_s28 = sand.u32 1, %s552_s10   ;;  %p782_p5 = scmp.ne.s32.totalorder %s776_s18, 0 }
  0x3f   : > { %541 = vsyncadd (%p781_p12), [#allocation4], 4294967280  ;;  %s410_s29 = smul.u32 24, %s147_s28  ;;  %s148_s30 = scalar_lea.sflag [#allocation3], %s147_s28 }
  0x41   : > { %s151_s3 = scalar_lea.vmem [#allocation5], %s410_s29 }
  0x42   : > { %543 = dma.done.wait (%p782_p5), %s148_s30, 384  }
  0x43   : > { %545 = vsyncadd (%p782_p5), %s148_s30, 4294966912 }
  0x44   : > { %156 = sfence }
  0x45   : > { %s179_s19 = sld [smem:[#allocation2]]  ;;  %s382_s25 = sld [smem:[#allocation2 + $0x5]]  ;;  %v698_v0 = vld [vmem:[%s151_s3] sm:$0xff]  ;;  %v700_v1 = vld [vmem:[%s151_s3 + $0x8] sm:$0xff]  ;;  %v702_v2 = vld [vmem:[%s151_s3 + $0x10] sm:$0xff] }
  0x46   : > { %s383_s4 = sld [smem:[#allocation2 + $0xa]]  ;;  %s696_s5 = sld [smem:[#allocation2 + $0xf]] }
  0x47   : > { %s386_s6 = sld [smem:[#allocation2 + $0x1]]  ;;  %s387_s7 = sld [smem:[#allocation2 + $0x6]] }
  0x48   : > { %s388_s8 = sld [smem:[#allocation2 + $0xb]]  ;;  %s704_s9 = sld [smem:[#allocation2 + $0x10]] }
  0x49   : > { %s391_s12 = sld [smem:[#allocation2 + $0x2]]  ;;  %s392_s18 = sld [smem:[#allocation2 + $0x7]] }
  0x4a   : > { %s706_s15 = sld [smem:[#allocation2 + $0xc]]  ;;  %s709_s16 = sld [smem:[#allocation2 + $0x11]] }
  0x4b   : > { %v180_v3 = vstv %s179_s19  ;;  %v183_v5 = vstv %s382_s25  ;;  %s396_s20 = sld [smem:[#allocation2 + $0x3]]  ;;  %s713_s21 = sld [smem:[#allocation2 + $0x8]] }
  0x4c   : > { %v181_v4 = vmul.f32 %v180_v3, %v698_v0  ;;  %v187_v6 = vstv %s383_s4  ;;  %v184_v7 = vmul.f32 %v183_v5, %v700_v1  ;;  %s715_s22 = sld [smem:[#allocation2 + $0xd]]  ;;  %s719_s23 = sld [smem:[#allocation2 + $0x12]]  ;;  %v191_v15 = vstv %s696_s5 }
  0x4d   : > { %v188_v8 = vmul.f32 %v187_v6, %v702_v2  ;;  %v198_v9 = vstv %s386_s6  ;;  %v201_v10 = vstv %s387_s7  ;;  %s721_s24 = sld [smem:[#allocation2 + $0x4]]  ;;  %s725_s26 = sld [smem:[#allocation2 + $0x9]] }
  0x4e   : > { %v185_v11 = vadd.f32 %v184_v7, %v181_v4  ;;  %v199_v12 = vmul.f32 %v198_v9, %v698_v0  ;;  %v202_v13 = vmul.f32 %v201_v10, %v700_v1  ;;  %v205_v14 = vstv %s388_s8  ;;  %s727_s27 = sld [smem:[#allocation2 + $0xe]]  ;;  %s735_s28 = sld [smem:[#allocation2 + $0x13]] }
  0x4f   : > { %v206_v16 = vmul.f32 %v205_v14, %v702_v2  ;;  %v217_v17 = vstv %s391_s12  ;;  %v220_v21 = vstv %s392_s18  ;;  %v209_v22 = vstv %s704_s9  ;;  %s385_s29 = sld [smem:[#allocation2 + $0x14]]  ;;  %s390_s30 = sld [smem:[#allocation2 + $0x15]] }
  0x50   : > { %v189_v18 = vadd.f32 %v188_v8, %v185_v11  ;;  %v203_v19 = vadd.f32 %v202_v13, %v199_v12  ;;  %v218_v20 = vmul.f32 %v217_v17, %v698_v0  ;;  %v221_v23 = vmul.f32 %v220_v21, %v700_v1  ;;  %s395_s3 = sld [smem:[#allocation2 + $0x16]]  ;;  %s400_s19 = sld [smem:[#allocation2 + $0x17]] }
  0x51   : > { %v224_v24 = vstv %s706_s15  ;;  %v228_v25 = vstv %s709_s16  ;;  %v236_v29 = vstv %s396_s20  ;;  %v239_v32 = vstv %s713_s21  ;;  %s405_s25 = sld [smem:[#allocation2 + $0x18]]  ;;  %p172_p9 = scmp.lt.s32.totalorder %s600_s13, 1 }
  0x52   : > { %v192_v26 = vadd.f32 %v191_v15, %v189_v18  ;;  %v207_v27 = vadd.f32 %v206_v16, %v203_v19  ;;  %v225_v28 = vmul.f32 %v224_v24, %v702_v2  ;;  %v222_v30 = vadd.f32 %v221_v23, %v218_v20 }
  0x53   : > { %v237_v31 = vmul.f32 %v236_v29, %v698_v0  ;;  %v243_v33 = vstv %s715_s22  ;;  %v240_v35 = vmul.f32 %v239_v32, %v700_v1  ;;  %v255_v38 = vstv %s721_s24  ;;  %s788_s13 = smov (!%p172_p9, %s600_s13), 1 }
  0x54   : > { %463 = vtanh.f32 %v192_v26  ;;  %v210_v34 = vadd.f32 %v209_v22, %v207_v27  ;;  %v244_v36 = vmul.f32 %v243_v33, %v702_v2  ;;  %v226_v37 = vadd.f32 %v225_v28, %v222_v30  ;;  %s381_s4 = sshll.u32 %s788_s13, 3 }
  0x55   : > { %v241_v39 = vadd.f32 %v240_v35, %v237_v31  ;;  %v256_v40 = vmul.f32 %v255_v38, %v698_v0  ;;  %v258_v41 = vstv %s725_s26  ;;  %v247_v43 = vstv %s719_s23  ;;  %s175_s7 = scalar_lea.vmem %s773_s2, %s381_s4 }
  0x56   : > { %465 = vtanh.f32 %v210_v34  ;;  %v229_v42 = vadd.f32 %v228_v25, %v226_v37  ;;  %v259_v44 = vmul.f32 %v258_v41, %v700_v1  ;;  %v262_v45 = vstv %s727_s27 }
  0x57   : > { %v245_v46 = vadd.f32 %v244_v36, %v241_v39  ;;  %v263_v47 = vmul.f32 %v262_v45, %v702_v2  ;;  %v266_v50 = vstv %s735_s28  ;;  %v195_v52 = vstv %s385_s29 }
  0x58   : > { %467 = vtanh.f32 %v229_v42  ;;  %v260_v48 = vadd.f32 %v259_v44, %v256_v40  ;;  %v213_v55 = vstv %s390_s30  ;;  %v232_v59 = vstv %s395_s3 }
  0x59   : > { %v248_v49 = vadd.f32 %v247_v43, %v245_v46  ;;  %v251_v63 = vstv %s400_s19  ;;  %v270_v6 = vstv %s405_s25  ;;  %v279_v19 = vlaneseq }
  0x5a   : > { %v264_v51 = vadd.f32 %v263_v47, %v260_v48 }
  0x5b   : > { %469 = vtanh.f32 %v248_v49  ;;  %v280_v20 = vand.u32 127, %v279_v19 }
  0x5c   : > { %v267_v53 = vadd.f32 %v266_v50, %v264_v51 }
  0x5d   : > { %vm284_vm0 = vcmp.eq.s32.totalorder %v280_v20, 0  ;;  %vm289_vm1 = vcmp.eq.s32.totalorder %v280_v20, 1  ;;  %vm294_vm2 = vcmp.eq.s32.totalorder %v280_v20, 2 }
  0x5e   : > { %v464_v54 = vpop.eup %463  ;;  %471 = vtanh.f32 %v267_v53 }
  0x5f   : > { %v196_v56 = vmul.f32 %v464_v54, %v195_v52 }
  0x60   : > { %v466_v57 = vpop.eup %465 }
  0x61   : > { %v214_v58 = vmul.f32 %v466_v57, %v213_v55 }
  0x62   : > { %v468_v60 = vpop.eup %467 }
  0x63   : > { %v215_v61 = vadd.f32 %v214_v58, %v196_v56  ;;  %v233_v62 = vmul.f32 %v468_v60, %v232_v59 }
  0x65   : > { %v470_v3 = vpop.eup %469  ;;  %v234_v4 = vadd.f32 %v233_v62, %v215_v61 }
  0x66   : > { %v252_v5 = vmul.f32 %v470_v3, %v251_v63 }
  0x68   : > { %v472_v7 = vpop.eup %471  ;;  %v253_v8 = vadd.f32 %v252_v5, %v234_v4 }
  0x69   : > { %v271_v9 = vmul.f32 %v472_v7, %v270_v6 }
  0x6b   : > { %v272_v10 = vadd.f32 %v271_v9, %v253_v8 }
  0x6d   : > { %v273_v11 = vmul.f32 1.442695, %v272_v10 }
  0x6f   : > { %473 = vpow2.f32 %v273_v11 }
  0x79   : > { %v474_v12 = vpop.eup %473 }
  0x7a   : > { %275 = vadd.xlane.f32.xlu0 %v474_v12 }
 0x107   : > { %v276_v13 = vpop.xlane.xlu0 %275 }
 0x108   : > { %475 = vrcp.f32 %v276_v13 }
 0x112   : > { %v476_v14 = vpop.eup %475 }
 0x113   : > { %v278_v15 = vmul.f32 %v476_v14, %v474_v12 }
 0x115   : > { %v286_v16 = vmul.f32 %v278_v15, %v700_v1  ;;  %v281_v17 = vmul.f32 %v278_v15, %v698_v0  ;;  %v291_v18 = vmul.f32 %v278_v15, %v702_v2 }
 0x117   : > { %287 = vadd.xlane.f32.xlu1 %v286_v16  ;;  %282 = vadd.xlane.f32.xlu0 %v281_v17 }
 0x11b   : > { %292 = vadd.xlane.f32.xlu1 %v291_v18 }
 0x1a4   : > { %v288_v21 = vpop.xlane.xlu1 %287  ;;  %v283_v22 = vpop.xlane.xlu0 %282 }
 0x1a5   : > { %v285_v23 = vsel %vm284_vm0, %v283_v22, 0.0 }
 0x1a6   : > { %v290_v0 = vsel %vm289_vm1, %v288_v21, %v285_v23 }
 0x1a8   : > { %v293_v1 = vpop.xlane.xlu1 %292 }
 0x1a9   : > { %v295_v24 = vsel %vm294_vm2, %v293_v1, %v290_v0 }
 0x1aa   : > { %296 = vst [vmem:[%s175_s7] sm:$0xff] %v295_v24 }
 0x1ab PF: > { %p13_p13 = scmp.ge.s32.totalorder %s603_s14, 4   ;;  %s783_s9 = smov %s552_s10 }
 0x1ac   : > { %s784_s10 = smov %s556_s11  ;;  %s785_s11 = smov %s613_s17 }
 0x1ad   : > { %s786_s12 = smov %s603_s14  ;;  %15 = sbr.rel (!%p13_p13) target bundleno = 4 (0x4), region = 73 }
 0x1b4   :  { %316 = vsyncpa [#allocation3], 1 }
 0x1b5   :  { %318 = vsyncpa [#allocation3 + $0x1], 1 }
 0x1b6   :  { %319 = vsyncpa [#allocation4], 1 }
 0x1b7   :  { %321 = vsyncpa [#allocation4 + $0x1], 1 }

</bundles_post_ra>
